<compile_context>
chip_gen: v6e
topology: v6e:2x2x1
jax: 0.10.0
libtpu: 0.0.40
codegen_flags: <defaults>
</compile_context>

<pallas_src>
import numpy as np
import jax
import jax.numpy as jnp
from jax.experimental import pallas as pl
from jax.experimental.pallas import tpu as pltpu


def _downsample_kernel(x_ref, w1_ref, b1_ref, w2_ref, b2_ref, sel_ref,
                       out_ref, pool_ref):
    # x_ref:   (bt, H, W*Cin_p)         bf16, lane-packed (w, ci)
    # w1_ref:  (W*Cin_p, 3*W*Cout)      bf16 banded conv1 weights (ky-major N)
    # b1_ref:  (1, W*Cout)              f32 bias tiled over w
    # w2_ref:  (W*Cout, 3*W*Cout)       bf16 banded conv2 weights
    # b2_ref:  (1, W*Cout)              f32
    # sel_ref: (W*Cout, 2*(W//2)*Cout)  bf16 fused pool selector [even | odd]
    # out_ref:  (bt, H, W*Cout)         f32 lane-packed conv output
    # pool_ref: (bt, H//2, 2*(W//2)*Cout) f32, pooled value mirrored in lanes
    bt, H, wco = out_ref.shape
    wci = x_ref.shape[2]
    wpo = pool_ref.shape[2] // 2
    rows = bt * H

    # Row-within-image masks for the ky=0 / ky=2 taps: zero the wrapped row at
    # the top/bottom image edge AND at stacked-batch boundaries.  Hoisted so
    # both convs reuse them (broadcasts are not CSE'd by JAX).
    row_in_img = jax.lax.broadcasted_iota(jnp.int32, (rows, wco), 0) % H
    not_top = row_in_img != 0
    not_bot = row_in_img != H - 1

    def conv(lhs_bf16, w_ref, b_ref):
        # Single fat bf16 MXU matmul: the banded RHS already contains the kx
        # taps and the W-edge zero padding for all three ky row taps.
        r = jnp.dot(lhs_bf16, w_ref[...], preferred_element_type=jnp.float32)
        r0 = r[:, 0 * wco:1 * wco]        # ky = 0 tap (needs row h-1)
        r1 = r[:, 1 * wco:2 * wco]        # ky = 1 tap (row h)
        r2 = r[:, 2 * wco:3 * wco]        # ky = 2 tap (needs row h+1)
        # ky row shifts on the XLU (pltpu.roll) + VPU edge masks instead of
        # 0/1 shift matmuls (review #1): no f32 MXU passes, no du operand.
        r0s = jnp.where(not_top, pltpu.roll(r0, shift=1, axis=0), 0.0)
        r2s = jnp.where(not_bot, pltpu.roll(r2, shift=rows - 1, axis=0), 0.0)
        return jnp.maximum(r0s + r1 + r2s + b_ref[...], 0.0)

    # Stack the batch tile into the matmul M dimension (review #3).
    x = x_ref[...].reshape(rows, wci)                       # (bt*H, W*Cin_p)
    h1 = conv(x, w1_ref, b1_ref)                            # (bt*H, W*Cout) f32
    h2 = conv(h1.astype(w2_ref.dtype), w2_ref, b2_ref)      # single bf16 cast
    out_ref[...] = h2.reshape(bt, H, wco).astype(out_ref.dtype)   # lane-dense

    # 2x2 max pool, stride 2:
    #   rows: lane-preserving reshape + VPU max over row pairs (never crosses
    #         a batch boundary since H is even),
    #   cols: one fused lane-dense bf16 selector matmul producing
    #         [even-col picks | odd-col picks] side by side, then an XLU lane
    #         roll + VPU max.  The pooled value lands in lanes [0, wpo) and is
    #         mirrored in [wpo, 2*wpo), so every store below is an unmasked
    #         full-width vst (review #2); the wrapper slices off the mirror.
    hp = jnp.max(h2.reshape(rows // 2, 2, wco), axis=1)     # (bt*H/2, W*Cout)
    pe_po = jnp.dot(hp.astype(sel_ref.dtype), sel_ref[...],
                    preferred_element_type=jnp.float32)     # (bt*H/2, 2*wpo)
    pooled = jnp.maximum(pe_po, pltpu.roll(pe_po, shift=wpo, axis=1))
    pool_ref[...] = pooled.reshape(bt, H // 2, 2 * wpo).astype(pool_ref.dtype)


def _banded_conv_weight(w_hwio, width):
    """(3,3,Ci,Co) HWIO -> (width*Ci, 3*width*Co) banded matmul RHS.

    out[u*Ci+ci, ky*width*Co + w*Co + co] = w[ky, u-w+1, ci, co] for |u-w| <= 1
    (zero otherwise).  Folds the kx taps and the W-edge zero padding of a
    padding=1 conv into a single dense matmul in the lane-packed (w, c) domain.
    NOTE: size is O(W^2); for large W split the 3*W*Co N dimension (ky taps or
    W tiles) over an extra grid axis to stay inside the v7x VMEM budget.
    """
    kh, kw, ci, co = w_hwio.shape
    w_np = np.asarray(w_hwio, np.float32)
    out = np.zeros((width * ci, kh * width * co), np.float32)
    for ky in range(kh):
        base = ky * width * co
        for w in range(width):
            for kx in range(kw):
                u = w + kx - 1
                if 0 <= u < width:
                    out[u * ci:(u + 1) * ci,
                        base + w * co:base + (w + 1) * co] = w_np[ky, kx]
    return out


def _pool_col_selector(width, co, parity):
    """0/1 matrix picking every other w-group of `co` lanes (exact selection)."""
    sel = np.zeros((width * co, (width // 2) * co), np.float32)
    for w2 in range(width // 2):
        w = 2 * w2 + parity
        for c in range(co):
            sel[w * co + c, w2 * co + c] = 1.0
    return sel


def _pick_batch_tile(batch, height):
    """Largest divisor of `batch` with bt*H <= 256 (fills the 256-row MXU)."""
    bt = 1
    for cand in range(1, batch + 1):
        if batch % cand == 0 and cand * height <= 256:
            bt = cand
    return bt


def downsample_forward(x_nchw, condition, w1, b1, w2, b2):
    """Pallas DownSample.forward. Returns (conv_out, pooled) in NCHW, f32."""
    B, Cin, H, W = x_nchw.shape
    cond = condition.shape[1]
    Cout = w1.shape[-1]
    assert H % 2 == 0 and W % 2 == 0, "MaxPool2d(2) needs even spatial dims"

    cin_tot = Cin + cond
    cin_p = -(-cin_tot // 8) * 8            # pad 7 -> 8: aligned K blocks
    bt = _pick_batch_tile(B, H)             # batch tile stacked into matmul M

    # --- host-side glue (free layout ops): add_condition, channel pad, pack ---
    x_nhwc = jnp.transpose(x_nchw, (0, 2, 3, 1))
    cond_b = jnp.broadcast_to(condition[:, None, None, :], (B, H, W, cond))
    xc = jnp.concatenate([x_nhwc, cond_b], axis=-1)
    xc = jnp.pad(xc, ((0, 0), (0, 0), (0, 0), (0, cin_p - cin_tot)))
    x_pk = xc.reshape(B, H, W * cin_p).astype(jnp.bfloat16)   # (B, H, W*Cin_p)

    # banded conv weights (exact host construction), bf16 for the MXU
    w1_np = np.zeros((3, 3, cin_p, Cout), np.float32)
    w1_np[:, :, :cin_tot, :] = np.asarray(w1, np.float32)
    w1_b = jnp.asarray(_banded_conv_weight(w1_np, W), jnp.bfloat16)
    w2_b = jnp.asarray(_banded_conv_weight(np.asarray(w2, np.float32), W),
                       jnp.bfloat16)

    b1_t = jnp.tile(jnp.asarray(b1, jnp.float32), W).reshape(1, W * Cout)
    b2_t = jnp.tile(jnp.asarray(b2, jnp.float32), W).reshape(1, W * Cout)

    # fused pooling column selector [even | odd]: one lane-dense bf16 operand
    sel_np = np.concatenate([_pool_col_selector(W, Cout, 0),
                             _pool_col_selector(W, Cout, 1)], axis=1)
    sel_b = jnp.asarray(sel_np, jnp.bfloat16)

    wci, wco, wpo = W * cin_p, W * Cout, (W // 2) * Cout

    # Explicit VMEM budget (review #5): double-buffered blocks + headroom,
    # capped below v7x's 64 MiB physical VMEM.  For larger W also consider
    # pipeline_mode=pl.Buffered(1) on the grid-invariant weight blocks and
    # splitting 3*W*Cout over a grid axis.
    def _nbytes(shape, dtype):
        return int(np.prod(shape)) * np.dtype(dtype).itemsize
    block_bytes = (
        _nbytes((bt, H, wci), jnp.bfloat16)
        + _nbytes((wci, 3 * wco), jnp.bfloat16)
        + _nbytes((wco, 3 * wco), jnp.bfloat16)
        + _nbytes((wco, 2 * wpo), jnp.bfloat16)
        + 2 * _nbytes((1, wco), jnp.float32)
        + _nbytes((bt, H, wco), jnp.float32)
        + _nbytes((bt, H // 2, 2 * wpo), jnp.float32))
    vmem_limit = int(min(max(2 * block_bytes + (8 << 20), 16 << 20), 48 << 20))

    grid_spec = pltpu.PrefetchScalarGridSpec(
        num_scalar_prefetch=0,
        grid=(B // bt,),
        in_specs=[
            pl.BlockSpec((bt, H, wci), lambda b: (b, 0, 0)),
            pl.BlockSpec((wci, 3 * wco), lambda b: (0, 0)),   # constant idx:
            pl.BlockSpec((1, wco), lambda b: (0, 0)),         # fetched once
            pl.BlockSpec((wco, 3 * wco), lambda b: (0, 0)),
            pl.BlockSpec((1, wco), lambda b: (0, 0)),
            pl.BlockSpec((wco, 2 * wpo), lambda b: (0, 0)),
        ],
        out_specs=[
            pl.BlockSpec((bt, H, wco), lambda b: (b, 0, 0)),
            pl.BlockSpec((bt, H // 2, 2 * wpo), lambda b: (b, 0, 0)),
        ],
    )

    conv_pk, pool_pk = pl.pallas_call(
        _downsample_kernel,
        out_shape=(
            jax.ShapeDtypeStruct((B, H, wco), jnp.float32),
            jax.ShapeDtypeStruct((B, H // 2, 2 * wpo), jnp.float32),
        ),
        grid_spec=grid_spec,
        compiler_params=pltpu.CompilerParams(
            dimension_semantics=("parallel",),    # batch tiles across TCs
            vmem_limit_bytes=vmem_limit),
    )(x_pk, w1_b, b1_t, w2_b, b2_t, sel_b)

    # unpack lanes -> PyTorch NCHW convention (free XLA layout ops);
    # drop the mirrored upper pooled lanes (kept only for unmasked stores).
    conv_out = jnp.transpose(conv_pk.reshape(B, H, W, Cout), (0, 3, 1, 2))
    pooled = jnp.transpose(
        pool_pk[:, :, :wpo].reshape(B, H // 2, W // 2, Cout), (0, 3, 1, 2))
    return conv_out, pooled


def _reference(x_nchw, condition, w1, b1, w2, b2):
    """Pure-JAX reference (lax conv, f32) for correctness check."""
    B, Cin, H, W = x_nchw.shape
    x = jnp.transpose(x_nchw, (0, 2, 3, 1))
    cond_b = jnp.broadcast_to(condition[:, None, None, :],
                              (B, H, W, condition.shape[1]))
    xc = jnp.concatenate([x, cond_b], axis=-1)
    dn = ("NHWC", "HWIO", "NHWC")
    h1 = jax.nn.relu(jax.lax.conv_general_dilated(
        xc, w1, (1, 1), "SAME", dimension_numbers=dn) + b1)
    h2 = jax.nn.relu(jax.lax.conv_general_dilated(
        h1, w2, (1, 1), "SAME", dimension_numbers=dn) + b2)
    pool = jax.lax.reduce_window(h2, -jnp.inf, jax.lax.max,
                                 (1, 2, 2, 1), (1, 2, 2, 1), "VALID")
    return (jnp.transpose(h2, (0, 3, 1, 2)),
            jnp.transpose(pool, (0, 3, 1, 2)))


if __name__ == "__main__":
    B, Cin, H, W = 2, 4, 16, 16
    cond_size, Cout = 3, 8

    key = jax.random.PRNGKey(0)
    kx, kc, k1, kb1, k2, kb2 = jax.random.split(key, 6)

    x = jax.random.normal(kx, (B, Cin, H, W), jnp.float32)       # NCHW like PyTorch
    condition = jax.random.normal(kc, (B, cond_size), jnp.float32)

    # deterministic synthetic parameters (HWIO layout for the conv weights)
    w1 = jax.random.normal(k1, (3, 3, Cin + cond_size, Cout), jnp.float32) * 0.1
    b1 = jax.random.normal(kb1, (Cout,), jnp.float32) * 0.1
    w2 = jax.random.normal(k2, (3, 3, Cout, Cout), jnp.float32) * 0.1
    b2 = jax.random.normal(kb2, (Cout,), jnp.float32) * 0.1

    conv_out, pool_out = downsample_forward(x, condition, w1, b1, w2, b2)
    jax.block_until_ready((conv_out, pool_out))

    ref_conv, ref_pool = _reference(x, condition, w1, b1, w2, b2)
    assert conv_out.shape == (B, Cout, H, W)
    assert pool_out.shape == (B, Cout, H // 2, W // 2)
    assert jnp.allclose(conv_out, ref_conv, atol=2e-2, rtol=2e-2)
    assert jnp.allclose(pool_out, ref_pool, atol=2e-2, rtol=2e-2)

    print("KERNEL_OK")
</pallas_src>

<mosaic_0001>
module attributes {stable_mosaic.version = 11 : i64} {
  func.func @_downsample_kernel(%arg0: i32, %arg1: memref<2x16x128xbf16, #tpu.memory_space<vmem>>, %arg2: memref<128x384xbf16, #tpu.memory_space<vmem>>, %arg3: memref<1x128xf32, #tpu.memory_space<vmem>>, %arg4: memref<128x384xbf16, #tpu.memory_space<vmem>>, %arg5: memref<1x128xf32, #tpu.memory_space<vmem>>, %arg6: memref<128x128xbf16, #tpu.memory_space<vmem>>, %arg7: memref<2x16x128xf32, #tpu.memory_space<vmem>>, %arg8: memref<2x8x128xf32, #tpu.memory_space<vmem>>) attributes {dimension_semantics = [#tpu.dimension_semantics<parallel>], iteration_bounds = array<i64: 1>, scalar_prefetch = 0 : i64, scratch_operands = 0 : i64, tpu.core_type = #tpu.core_type<tc>, window_params = [{transform_indices = @transform_0, window_bounds = array<i64: 2, 16, 128>}, {pipeline_mode = #tpu.pipeline_mode<synchronous>, transform_indices = @transform_1, window_bounds = array<i64: 128, 384>}, {pipeline_mode = #tpu.pipeline_mode<synchronous>, transform_indices = @transform_2, window_bounds = array<i64: 1, 128>}, {pipeline_mode = #tpu.pipeline_mode<synchronous>, transform_indices = @transform_3, window_bounds = array<i64: 128, 384>}, {pipeline_mode = #tpu.pipeline_mode<synchronous>, transform_indices = @transform_4, window_bounds = array<i64: 1, 128>}, {pipeline_mode = #tpu.pipeline_mode<synchronous>, transform_indices = @transform_5, window_bounds = array<i64: 128, 128>}, {transform_indices = @transform_6, window_bounds = array<i64: 2, 16, 128>}, {transform_indices = @transform_7, window_bounds = array<i64: 2, 8, 128>}]} {
    %0 = tpu.iota {dimensions = array<i32: 0>} : vector<32x128xi32>
    %c16_i32 = arith.constant 16 : i32
    %c0_i32 = arith.constant 0 : i32
    %1 = arith.cmpi eq, %c16_i32, %c0_i32 : i32
    %c1_i32 = arith.constant 1 : i32
    %2 = arith.select %1, %c1_i32, %c16_i32 : i32
    %3 = vector.broadcast %2 : i32 to vector<32x128xi32>
    %4 = arith.remsi %0, %3 : vector<32x128xi32>
    %c0_i32_0 = arith.constant 0 : i32
    %5 = vector.broadcast %c0_i32_0 : i32 to vector<32x128xi32>
    %6 = arith.cmpi ne, %4, %5 : vector<32x128xi32>
    %c0_i32_1 = arith.constant 0 : i32
    %7 = vector.broadcast %c0_i32_1 : i32 to vector<32x128xi32>
    %8 = arith.cmpi slt, %4, %7 : vector<32x128xi32>
    %c0_i32_2 = arith.constant 0 : i32
    %9 = arith.cmpi slt, %2, %c0_i32_2 : i32
    %10 = vector.broadcast %9 : i1 to vector<32x128xi1>
    %11 = vector.broadcast %10 : vector<32x128xi1> to vector<32x128xi1>
    %12 = arith.xori %8, %11 : vector<32x128xi1>
    %13 = arith.andi %12, %6 : vector<32x128xi1>
    %14 = vector.broadcast %2 : i32 to vector<32x128xi32>
    %15 = arith.addi %4, %14 : vector<32x128xi32>
    %16 = arith.select %13, %15, %4 : vector<32x128xi1>, vector<32x128xi32>
    %c0_i32_3 = arith.constant 0 : i32
    %17 = vector.broadcast %c0_i32_3 : i32 to vector<32x128xi32>
    %18 = arith.cmpi ne, %16, %17 : vector<32x128xi32>
    %c15_i32 = arith.constant 15 : i32
    %19 = vector.broadcast %c15_i32 : i32 to vector<32x128xi32>
    %20 = arith.cmpi ne, %16, %19 : vector<32x128xi32>
    %c0 = arith.constant 0 : index
    %c0_4 = arith.constant 0 : index
    %c0_5 = arith.constant 0 : index
    %21 = vector.load %arg1[%c0, %c0_4, %c0_5] : memref<2x16x128xbf16, #tpu.memory_space<vmem>>, vector<2x16x128xbf16>
    %22 = vector.shape_cast %21 : vector<2x16x128xbf16> to vector<32x128xbf16>
    %c0_6 = arith.constant 0 : index
    %c0_7 = arith.constant 0 : index
    %23 = vector.load %arg2[%c0_6, %c0_7] : memref<128x384xbf16, #tpu.memory_space<vmem>>, vector<128x384xbf16>
    %cst = arith.constant dense<0.000000e+00> : vector<32x384xf32>
    %24 = tpu.matmul %22, %23, %cst {dimension_numbers = #tpu.dot_dimension_numbers<[1], [0], [0], [1], [0, 0, 1, 1], [], []>} : vector<32x128xbf16>, vector<128x384xbf16>, vector<32x384xf32> -> vector<32x384xf32>
    %25 = vector.extract_strided_slice %24 {offsets = [0, 0], sizes = [32, 128], strides = [1, 1]} : vector<32x384xf32> to vector<32x128xf32>
    %26 = vector.extract_strided_slice %24 {offsets = [0, 128], sizes = [32, 128], strides = [1, 1]} : vector<32x384xf32> to vector<32x128xf32>
    %27 = vector.extract_strided_slice %24 {offsets = [0, 256], sizes = [32, 128], strides = [1, 1]} : vector<32x384xf32> to vector<32x128xf32>
    %c1_i32_8 = arith.constant 1 : i32
    %28 = tpu.dynamic_rotate %25 by %c1_i32_8 dim 0 : vector<32x128xf32>, i32 -> vector<32x128xf32>
    %cst_9 = arith.constant 0.000000e+00 : f32
    %29 = vector.broadcast %cst_9 : f32 to vector<32x128xf32>
    %30 = arith.select %18, %28, %29 : vector<32x128xi1>, vector<32x128xf32>
    %c31_i32 = arith.constant 31 : i32
    %31 = tpu.dynamic_rotate %27 by %c31_i32 dim 0 : vector<32x128xf32>, i32 -> vector<32x128xf32>
    %cst_10 = arith.constant 0.000000e+00 : f32
    %32 = vector.broadcast %cst_10 : f32 to vector<32x128xf32>
    %33 = arith.select %20, %31, %32 : vector<32x128xi1>, vector<32x128xf32>
    %34 = arith.addf %30, %26 : vector<32x128xf32>
    %35 = arith.addf %34, %33 : vector<32x128xf32>
    %c0_11 = arith.constant 0 : index
    %c0_12 = arith.constant 0 : index
    %36 = vector.load %arg3[%c0_11, %c0_12] : memref<1x128xf32, #tpu.memory_space<vmem>>, vector<1x128xf32>
    %37 = vector.broadcast %36 : vector<1x128xf32> to vector<32x128xf32>
    %38 = arith.addf %35, %37 : vector<32x128xf32>
    %cst_13 = arith.constant 0.000000e+00 : f32
    %39 = vector.broadcast %cst_13 : f32 to vector<32x128xf32>
    %40 = arith.maximumf %38, %39 : vector<32x128xf32>
    %41 = arith.truncf %40 : vector<32x128xf32> to vector<32x128xbf16>
    %c0_14 = arith.constant 0 : index
    %c0_15 = arith.constant 0 : index
    %42 = vector.load %arg4[%c0_14, %c0_15] : memref<128x384xbf16, #tpu.memory_space<vmem>>, vector<128x384xbf16>
    %cst_16 = arith.constant dense<0.000000e+00> : vector<32x384xf32>
    %43 = tpu.matmul %41, %42, %cst_16 {dimension_numbers = #tpu.dot_dimension_numbers<[1], [0], [0], [1], [0, 0, 1, 1], [], []>} : vector<32x128xbf16>, vector<128x384xbf16>, vector<32x384xf32> -> vector<32x384xf32>
    %44 = vector.extract_strided_slice %43 {offsets = [0, 0], sizes = [32, 128], strides = [1, 1]} : vector<32x384xf32> to vector<32x128xf32>
    %45 = vector.extract_strided_slice %43 {offsets = [0, 128], sizes = [32, 128], strides = [1, 1]} : vector<32x384xf32> to vector<32x128xf32>
    %46 = vector.extract_strided_slice %43 {offsets = [0, 256], sizes = [32, 128], strides = [1, 1]} : vector<32x384xf32> to vector<32x128xf32>
    %c1_i32_17 = arith.constant 1 : i32
    %47 = tpu.dynamic_rotate %44 by %c1_i32_17 dim 0 : vector<32x128xf32>, i32 -> vector<32x128xf32>
    %cst_18 = arith.constant 0.000000e+00 : f32
    %48 = vector.broadcast %cst_18 : f32 to vector<32x128xf32>
    %49 = arith.select %18, %47, %48 : vector<32x128xi1>, vector<32x128xf32>
    %c31_i32_19 = arith.constant 31 : i32
    %50 = tpu.dynamic_rotate %46 by %c31_i32_19 dim 0 : vector<32x128xf32>, i32 -> vector<32x128xf32>
    %cst_20 = arith.constant 0.000000e+00 : f32
    %51 = vector.broadcast %cst_20 : f32 to vector<32x128xf32>
    %52 = arith.select %20, %50, %51 : vector<32x128xi1>, vector<32x128xf32>
    %53 = arith.addf %49, %45 : vector<32x128xf32>
    %54 = arith.addf %53, %52 : vector<32x128xf32>
    %c0_21 = arith.constant 0 : index
    %c0_22 = arith.constant 0 : index
    %55 = vector.load %arg5[%c0_21, %c0_22] : memref<1x128xf32, #tpu.memory_space<vmem>>, vector<1x128xf32>
    %56 = vector.broadcast %55 : vector<1x128xf32> to vector<32x128xf32>
    %57 = arith.addf %54, %56 : vector<32x128xf32>
    %cst_23 = arith.constant 0.000000e+00 : f32
    %58 = vector.broadcast %cst_23 : f32 to vector<32x128xf32>
    %59 = arith.maximumf %57, %58 : vector<32x128xf32>
    %60 = vector.shape_cast %59 : vector<32x128xf32> to vector<2x16x128xf32>
    %c0_24 = arith.constant 0 : index
    %c0_25 = arith.constant 0 : index
    %c0_26 = arith.constant 0 : index
    %61 = vector.load %arg7[%c0_24, %c0_25, %c0_26] : memref<2x16x128xf32, #tpu.memory_space<vmem>>, vector<2x16x128xf32>
    tpu.vector_store %arg7[%c0_24, %c0_25, %c0_26], %60 {strides = array<i32>} : memref<2x16x128xf32, #tpu.memory_space<vmem>>, vector<2x16x128xf32>,
    %62 = vector.shape_cast %59 : vector<32x128xf32> to vector<16x2x128xf32>
    %cst_27 = arith.constant dense<0xFF800000> : vector<16x128xf32>
    %63 = vector.multi_reduction <maximumf>, %62, %cst_27 [1] : vector<16x2x128xf32> to vector<16x128xf32>
    %64 = arith.truncf %63 : vector<16x128xf32> to vector<16x128xbf16>
    %c0_28 = arith.constant 0 : index
    %c0_29 = arith.constant 0 : index
    %65 = vector.load %arg6[%c0_28, %c0_29] : memref<128x128xbf16, #tpu.memory_space<vmem>>, vector<128x128xbf16>
    %cst_30 = arith.constant dense<0.000000e+00> : vector<16x128xf32>
    %66 = tpu.matmul %64, %65, %cst_30 {dimension_numbers = #tpu.dot_dimension_numbers<[1], [0], [0], [1], [0, 0, 1, 1], [], []>} : vector<16x128xbf16>, vector<128x128xbf16>, vector<16x128xf32> -> vector<16x128xf32>
    %c64_i32 = arith.constant 64 : i32
    %67 = tpu.dynamic_rotate %66 by %c64_i32 dim 1 : vector<16x128xf32>, i32 -> vector<16x128xf32>
    %68 = arith.maximumf %66, %67 : vector<16x128xf32>
    %69 = vector.shape_cast %68 : vector<16x128xf32> to vector<2x8x128xf32>
    %c0_31 = arith.constant 0 : index
    %c0_32 = arith.constant 0 : index
    %c0_33 = arith.constant 0 : index
    %70 = vector.load %arg8[%c0_31, %c0_32, %c0_33] : memref<2x8x128xf32, #tpu.memory_space<vmem>>, vector<2x8x128xf32>
    tpu.vector_store %arg8[%c0_31, %c0_32, %c0_33], %69 {strides = array<i32>} : memref<2x8x128xf32, #tpu.memory_space<vmem>>, vector<2x8x128xf32>,
    return
  }
  func.func @transform_0(%arg0: i32) -> (i32, i32, i32) {
    %c0_i32 = arith.constant 0 : i32
    %c0_i32_0 = arith.constant 0 : i32
    %c0_i32_1 = arith.constant 0 : i32
    return %arg0, %c0_i32, %c0_i32_0 : i32, i32, i32
  }
  func.func @transform_1(%arg0: i32) -> (i32, i32) {
    %c0_i32 = arith.constant 0 : i32
    %c0_i32_0 = arith.constant 0 : i32
    %c0_i32_1 = arith.constant 0 : i32
    return %c0_i32, %c0_i32_0 : i32, i32
  }
  func.func @transform_2(%arg0: i32) -> (i32, i32) {
    %c0_i32 = arith.constant 0 : i32
    %c0_i32_0 = arith.constant 0 : i32
    %c0_i32_1 = arith.constant 0 : i32
    return %c0_i32, %c0_i32_0 : i32, i32
  }
  func.func @transform_3(%arg0: i32) -> (i32, i32) {
    %c0_i32 = arith.constant 0 : i32
    %c0_i32_0 = arith.constant 0 : i32
    %c0_i32_1 = arith.constant 0 : i32
    return %c0_i32, %c0_i32_0 : i32, i32
  }
  func.func @transform_4(%arg0: i32) -> (i32, i32) {
    %c0_i32 = arith.constant 0 : i32
    %c0_i32_0 = arith.constant 0 : i32
    %c0_i32_1 = arith.constant 0 : i32
    return %c0_i32, %c0_i32_0 : i32, i32
  }
  func.func @transform_5(%arg0: i32) -> (i32, i32) {
    %c0_i32 = arith.constant 0 : i32
    %c0_i32_0 = arith.constant 0 : i32
    %c0_i32_1 = arith.constant 0 : i32
    return %c0_i32, %c0_i32_0 : i32, i32
  }
  func.func @transform_6(%arg0: i32) -> (i32, i32, i32) {
    %c0_i32 = arith.constant 0 : i32
    %c0_i32_0 = arith.constant 0 : i32
    %c0_i32_1 = arith.constant 0 : i32
    return %arg0, %c0_i32, %c0_i32_0 : i32, i32, i32
  }
  func.func @transform_7(%arg0: i32) -> (i32, i32, i32) {
    %c0_i32 = arith.constant 0 : i32
    %c0_i32_0 = arith.constant 0 : i32
    %c0_i32_1 = arith.constant 0 : i32
    return %arg0, %c0_i32, %c0_i32_0 : i32, i32, i32
  }
}

</mosaic_0001>

<bundles_post_ra>
// kernel: tpu_custom_call.1
= control target key start
LH: loop header
LB: loop body
LE: loop exit
PB: predicated region body
PF: predicated region fallthrough
CT: control target
= control target key end

     0   :  { %13 = vsyncpa [#allocation3], 0  ;;  %s1808_s0 = inlined_call_operand.hbm [shape: bf16[2,16,128], index: 0, kind: input, shape index: {}]   ;;  %s1809_s1 = inlined_call_operand.hbm [shape: bf16[128,384], index: 1, kind: input, shape index: {}]   ;;  %s1810_s2 = inlined_call_operand.vmem [shape: f32[1,128], index: 2, kind: input, shape index: {}]   ;;  %s1811_s3 = inlined_call_operand.hbm [shape: bf16[128,384], index: 3, kind: input, shape index: {}]   ;;  %s1812_s4 = inlined_call_operand.vmem [shape: f32[1,128], index: 4, kind: input, shape index: {}]   ;;  %s1813_s5 = inlined_call_operand.hbm [shape: bf16[128,128], index: 5, kind: input, shape index: {}]   ;;  %s1814_s6 = inlined_call_operand.hbm [shape: f32[2,16,128], index: 6, kind: output, shape index: {0}]   ;;  %s1815_s7 = inlined_call_operand.hbm [shape: f32[2,8,128], index: 7, kind: output, shape index: {1}]  }
   0x1   :  { %14 = vsyncpa [#allocation6], 0 }
   0x2   :  { %15 = vsyncpa [#allocation9], 0 }
   0x3   :  { %16 = vsyncpa [#allocation4], 0 }
   0x4   :  { %17 = vsyncpa [#allocation12], 0  ;;  %s1575_s24 = smov [#allocation5]  }
   0x5   :  { %s35_s25 = sshll.u32 %s1575_s24, 4  ;;  %s36_s25 = int_to_ptr.vmem [resolvable:$true] %s35_s25 }
   0x6   :  { %s1453_s26 = scalar_lea.vmem %s36_s25, 3072  ;;  %p1458_p1 = scmp.lt.s32.totalorder %s36_s25, %s36_s25 }
   0x7   :  { %p1454_p0 = scmp.ne.s32.totalorder %s36_s25, %s1453_s26  ;;  %p1459_p2 = scmp.lt.s32.totalorder %s1453_s26, %s1453_s26 }
   0x9   :  { %p1460_p3 = por %p1459_p2, %p1458_p1 }
   0xb   :  { %p1461_p4 = pnand %p1460_p3, %p1454_p0 }
   0xd   :  { %1464 = shalt.err (!%p1461_p4)
}
   0xe   :  { %s1576_s27 = smov 192   ;;  %s1577_s28 = smov 12  }
   0xf   :  { %41 = dma.hbm_to_vmem [thread:$0]  %s1809_s1, 3072, %s36_s25, [#allocation6], %s1576_s27, %s1576_s27, %s1577_s28  }
  0x10   :  { %s1578_s8 = smov [#allocation2]  }
  0x11   :  { %s23_s9 = sshll.u32 %s1578_s8, 4  ;;  %s24_s9 = int_to_ptr.vmem [resolvable:$true] %s23_s9 }
  0x12   :  { %s1473_s10 = scalar_lea.vmem %s24_s9, 256  ;;  %p1478_p6 = scmp.lt.s32.totalorder %s24_s9, %s24_s9 }
  0x13   :  { %p1474_p5 = scmp.ne.s32.totalorder %s24_s9, %s1473_s10  ;;  %p1479_p7 = scmp.lt.s32.totalorder %s1473_s10, %s1473_s10 }
  0x15   :  { %p1480_p8 = por %p1479_p7, %p1478_p6 }
  0x17   :  { %p1481_p9 = pnand %p1480_p8, %p1474_p5 }
  0x19   :  { %1484 = shalt.err (!%p1481_p9)
}
  0x1a   :  { %s1579_s11 = smov 64   ;;  %s1580_s12 = smov 4  }
  0x1b   :  { %29 = dma.hbm_to_vmem [thread:$0]  %s1808_s0, 256, %s24_s9, [#allocation3], %s1579_s11, %s1579_s11, %s1580_s12  }
  0x1c   :  { %s1581_s15 = smov [#allocation7]   ;;  %s1582_s16 = smov [#allocation8]  }
  0x1d   :  { %s49_s1 = sshll.u32 %s1581_s15, 4  ;;  %s63_s17 = sshll.u32 %s1582_s16, 4  ;;  %s50_s1 = int_to_ptr.vmem [resolvable:$true] %s49_s1  ;;  %s64_s17 = int_to_ptr.vmem [resolvable:$true] %s63_s17 }
  0x1e   :  { %s1493_s18 = scalar_lea.vmem %s50_s1, 3072  ;;  %p1498_p11 = scmp.lt.s32.totalorder %s50_s1, %s50_s1 }
  0x1f   :  { %p1494_p10 = scmp.ne.s32.totalorder %s50_s1, %s1493_s18  ;;  %p1499_p12 = scmp.lt.s32.totalorder %s1493_s18, %s1493_s18 }
  0x21   :  { %p1500_p13 = por %p1499_p12, %p1498_p11 }
  0x23   :  { %p1501_p0 = pnand %p1500_p13, %p1494_p10 }
  0x25   :  { %1504 = shalt.err (!%p1501_p0)
}
  0x26   :  { %55 = dma.hbm_to_vmem [thread:$0]  %s1811_s3, 3072, %s50_s1, [#allocation6], %s1576_s27, %s1576_s27, %s1577_s28  }
  0x27   :  { %s1513_s0 = scalar_lea.vmem %s64_s17, 1024  ;;  %p1518_p2 = scmp.lt.s32.totalorder %s64_s17, %s64_s17 }
  0x28   :  { %p1514_p1 = scmp.ne.s32.totalorder %s64_s17, %s1513_s0  ;;  %p1519_p3 = scmp.lt.s32.totalorder %s1513_s0, %s1513_s0 }
  0x2a   :  { %p1520_p4 = por %p1519_p3, %p1518_p2 }
  0x2c   :  { %p1521_p5 = pnand %p1520_p4, %p1514_p1 }
  0x2e   :  { %1524 = shalt.err (!%p1521_p5)
}
  0x2f   :  { %69 = dma.hbm_to_vmem [thread:$0]  %s1813_s5, 1024, %s64_s17, [#allocation9], %s1579_s11, %s1579_s11, %s1580_s12  }
  0x30   :  { %1565 = dma.done.wait [#allocation3], 256  }
  0x31   :  { %1566 = vsyncadd [#allocation3], 4294967040 }
  0x32   :  { %1567 = dma.done.wait [#allocation6], 6144  }
  0x33   :  { %1568 = vsyncadd [#allocation6], 4294961152 }
  0x34   :  { %1569 = dma.done.wait [#allocation9], 1024  }
  0x35   :  { %1570 = vsyncadd [#allocation9], 4294966272  ;;  %v1583_v0 = vmov 0   ;;  %v1371_v1 = vld [vmem:[#allocation5 + $0xac] ss:$12 sps:$4 sm:$0xff]   ;;  %v1403_v18 = vld [vmem:[#allocation2] sm:$0xff]   ;;  %v83_v51 = vlaneseq }
  0x36   :  { %352 = vmatprep.mubr.bf16.mxu0 %v1583_v0  ;;  %v1373_v2 = vld [vmem:[#allocation5 + $0xb0] ss:$12 sps:$4 sm:$0xff]   ;;  %320 = vmatprep.subr.bf16.mxu0 %v1371_v1  ;;  %v1374_v3 = vld [vmem:[#allocation5 + $0xa8] ss:$12 sps:$4 sm:$0xff]   ;;  %v1377_v5 = vld [vmem:[#allocation5 + $0x98] ss:$12 sps:$4 sm:$0xff]  }
  0x37   :  { %1295 = vmatprep.subr.bf16.mxu1 %v1373_v2  ;;  %v1375_v4 = vld [vmem:[#allocation5 + $0x94] ss:$12 sps:$4 sm:$0xff]   ;;  %321 = vmatpush1.bf16.msra.mxu0 %v1374_v3  ;;  %v1378_v6 = vld [vmem:[#allocation5 + $0x90] ss:$12 sps:$4 sm:$0xff]   ;;  %v1382_v9 = vld [vmem:[#allocation5 + $0x78] ss:$12 sps:$4 sm:$0xff]  }
  0x38   :  { %1296 = vmatpush3.bf16.msra.mxu1 %v1373_v2  ;;  %322 = vmatprep.subr.bf16.mxu0 %v1375_v4  ;;  %v1379_v7 = vld [vmem:[#allocation5 + $0x7c] ss:$12 sps:$4 sm:$0xff]   ;;  %v1381_v8 = vld [vmem:[#allocation5 + $0x80] ss:$12 sps:$4 sm:$0xff]   ;;  %v1383_v10 = vld [vmem:[#allocation5 + $0x64] ss:$12 sps:$4 sm:$0xff]  }
  0x39   :  { %1297 = vmatprep.subr.bf16.mxu1 %v1377_v5  ;;  %v1385_v11 = vld [vmem:[#allocation5 + $0x68] ss:$12 sps:$4 sm:$0xff]   ;;  %v1386_v12 = vld [vmem:[#allocation5 + $0x60] ss:$12 sps:$4 sm:$0xff]   ;;  %v1389_v14 = vld [vmem:[#allocation5 + $0x50] ss:$12 sps:$4 sm:$0xff]   ;;  %1311 = vmatprep.mubr.bf16.mxu1 %v1403_v18 }
  0x3a   :  { %v1387_v13 = vld [vmem:[#allocation5 + $0x4c] ss:$12 sps:$4 sm:$0xff]   ;;  %v1390_v15 = vld [vmem:[#allocation5 + $0x48] ss:$12 sps:$4 sm:$0xff]   ;;  %v1394_v19 = vld [vmem:[#allocation5 + $0x30] ss:$12 sps:$4 sm:$0xff]  }
  0x3b   :  { %323 = vmatpush1.bf16.msra.mxu0 %v1378_v6  ;;  %v1391_v16 = vld [vmem:[#allocation5 + $0x34] ss:$12 sps:$4 sm:$0xff]   ;;  %v1393_v17 = vld [vmem:[#allocation5 + $0x38] ss:$12 sps:$4 sm:$0xff]   ;;  %v1395_v20 = vld [vmem:[#allocation5 + $0x1c] ss:$12 sps:$4 sm:$0xff]  }
  0x3c   :  { %1298 = vmatpush3.bf16.msra.mxu1 %v1377_v5  ;;  %324 = vmatprep.subr.bf16.mxu0 %v1379_v7  ;;  %v1397_v21 = vld [vmem:[#allocation5 + $0x20] ss:$12 sps:$4 sm:$0xff]   ;;  %v1398_v22 = vld [vmem:[#allocation5 + $0x18] ss:$12 sps:$4 sm:$0xff]   ;;  %v1401_v24 = vld [vmem:[#allocation5 + $0x8] ss:$12 sps:$4 sm:$0xff]  }
  0x3d   :  { %1299 = vmatprep.subr.bf16.mxu1 %v1381_v8  ;;  %v1399_v23 = vld [vmem:[#allocation5 + $0x4] ss:$12 sps:$4 sm:$0xff]   ;;  %v1402_v25 = vld [vmem:[#allocation5] ss:$12 sps:$4 sm:$0xff]   ;;  %v1404_v28 = vld [vmem:[#allocation2 + $0x8] sm:$0xff]   ;;  %v1656_v52 = vshrl.u32 %v83_v51, 7 }
  0x3e   :  { %v1407_v26 = vld [vmem:[#allocation7 + $0xac] ss:$12 sps:$4 sm:$0xff]   ;;  %v1408_v27 = vld [vmem:[#allocation7 + $0xb0] ss:$12 sps:$4 sm:$0xff]   ;;  %v1405_v29 = vld [vmem:[#allocation7 + $0xa8] ss:$12 sps:$4 sm:$0xff]  }
  0x3f   :  { %325 = vmatpush1.bf16.msra.mxu0 %v1382_v9  ;;  %v1411_v30 = vld [vmem:[#allocation7 + $0x94] ss:$12 sps:$4 sm:$0xff]   ;;  %v1409_v31 = vld [vmem:[#allocation7 + $0x90] ss:$12 sps:$4 sm:$0xff]   ;;  %v1412_v32 = vld [vmem:[#allocation7 + $0x98] ss:$12 sps:$4 sm:$0xff]  }
  0x40   :  { %1300 = vmatpush3.bf16.msra.mxu1 %v1381_v8  ;;  %326 = vmatprep.subr.bf16.mxu0 %v1383_v10  ;;  %v1415_v33 = vld [vmem:[#allocation7 + $0x7c] ss:$12 sps:$4 sm:$0xff]   ;;  %v1413_v34 = vld [vmem:[#allocation7 + $0x78] ss:$12 sps:$4 sm:$0xff]   ;;  %v1416_v35 = vld [vmem:[#allocation7 + $0x80] ss:$12 sps:$4 sm:$0xff]  }
  0x41   :  { %1301 = vmatprep.subr.bf16.mxu1 %v1385_v11  ;;  %v1419_v36 = vld [vmem:[#allocation7 + $0x64] ss:$12 sps:$4 sm:$0xff]   ;;  %v1417_v37 = vld [vmem:[#allocation7 + $0x60] ss:$12 sps:$4 sm:$0xff]   ;;  %v1420_v38 = vld [vmem:[#allocation7 + $0x68] ss:$12 sps:$4 sm:$0xff]  }
  0x42   :  { %v1423_v39 = vld [vmem:[#allocation7 + $0x4c] ss:$12 sps:$4 sm:$0xff]   ;;  %v1421_v40 = vld [vmem:[#allocation7 + $0x48] ss:$12 sps:$4 sm:$0xff]   ;;  %v1424_v41 = vld [vmem:[#allocation7 + $0x50] ss:$12 sps:$4 sm:$0xff]  }
  0x43   :  { %327 = vmatpush1.bf16.msra.mxu0 %v1386_v12  ;;  %v1427_v42 = vld [vmem:[#allocation7 + $0x34] ss:$12 sps:$4 sm:$0xff]   ;;  %v1425_v43 = vld [vmem:[#allocation7 + $0x30] ss:$12 sps:$4 sm:$0xff]   ;;  %v1428_v44 = vld [vmem:[#allocation7 + $0x38] ss:$12 sps:$4 sm:$0xff]  }
  0x44   :  { %1302 = vmatpush3.bf16.msra.mxu1 %v1385_v11  ;;  %328 = vmatprep.subr.bf16.mxu0 %v1387_v13  ;;  %v1431_v45 = vld [vmem:[#allocation7 + $0x1c] ss:$12 sps:$4 sm:$0xff]   ;;  %v1429_v46 = vld [vmem:[#allocation7 + $0x18] ss:$12 sps:$4 sm:$0xff]   ;;  %v1432_v47 = vld [vmem:[#allocation7 + $0x20] ss:$12 sps:$4 sm:$0xff]  }
  0x45   :  { %1303 = vmatprep.subr.bf16.mxu1 %v1389_v14  ;;  %v1435_v48 = vld [vmem:[#allocation7 + $0x4] ss:$12 sps:$4 sm:$0xff]   ;;  %v1433_v49 = vld [vmem:[#allocation7] ss:$12 sps:$4 sm:$0xff]   ;;  %v1436_v50 = vld [vmem:[#allocation7 + $0x8] ss:$12 sps:$4 sm:$0xff]  }
  0x46   :  { %v85_v55 = vadd.s32 8, %v1656_v52  ;;  %v86_v56 = vadd.s32 16, %v1656_v52  ;;  %vm426_vm0 = vcmp.lt.s32.totalorder %v1656_v52, 1  ;;  %vm439_vm1 = vcmp.lt.s32.totalorder %v1656_v52, 7 }
  0x47   :  { %329 = vmatpush1.bf16.msra.mxu0 %v1390_v15  ;;  %v87_v5 = vadd.s32 24, %v1656_v52  ;;  %v92_v13 = vand.u32 15, %v1656_v52  ;;  %vm1585_vm6 = vmmov 0   ;;  %vm874_vm7 = vcmask 1041408  }
  0x48   :  { %1304 = vmatpush3.bf16.msra.mxu1 %v1389_v14  ;;  %330 = vmatprep.subr.bf16.mxu0 %v1391_v16  ;;  %v99_v61 = vand.u32 15, %v85_v55  ;;  %v106_v1 = vand.u32 15, %v86_v56  ;;  %v1438_v55 = vld [vmem:[#allocation8 + $0x30] sm:$0xff]   ;;  %v1439_v56 = vld [vmem:[#allocation8 + $0x28] sm:$0xff]   ;;  %vm1051_vm8 = vcmask 1041409   ;;  %vm1053_vm9 = vcmask 1042434  }
  0x49   :  { %1305 = vmatprep.subr.bf16.mxu1 %v1393_v17  ;;  %vm1682_vm4 = vcmp.ne.s32.totalorder %v92_v13, 0  ;;  %vm1055_vm10 = vcmask 1043459   ;;  %vm1057_vm11 = vcmask 1044484   ;;  %vm1059_vm12 = vcmask 1045509  }
  0x4a   :  { %vm1665_vm2 = vcmp.ne.s32.totalorder %v99_v61, 15  ;;  %vm1671_vm3 = vcmp.ne.s32.totalorder %v106_v1, 0  ;;  %vm1061_vm13 = vcmask 1046534   ;;  %vm1063_vm14 = vcmask 1047559  }
  0x4b   :  { %331 = vmatpush1.bf16.msra.mxu0 %v1394_v19 }
  0x4c   :  { %1306 = vmatpush3.bf16.msra.mxu1 %v1393_v17  ;;  %332 = vmatprep.subr.bf16.mxu0 %v1395_v20  ;;  %v113_v17 = vand.u32 15, %v87_v5 }
  0x4d   :  { %1307 = vmatprep.subr.bf16.mxu1 %v1397_v21 }
  0x4e   :  { %vm1686_vm5 = vcmp.ne.s32.totalorder %v113_v17, 15 }
  0x4f   :  { %333 = vmatpush1.bf16.msra.mxu0 %v1398_v22 }
  0x50   :  { %1308 = vmatpush3.bf16.msra.mxu1 %v1397_v21  ;;  %334 = vmatprep.subr.bf16.mxu0 %v1399_v23 }
  0x51   :  { %1309 = vmatprep.subr.bf16.mxu1 %v1401_v24 }
  0x53   :  { %335 = vmatpush1.bf16.msra.mxu0 %v1402_v25 }
  0x54   :  { %1310 = vmatpush3.bf16.msra.mxu1 %v1401_v24  ;;  %633 = vmatprep.subr.bf16.mxu0 %v1407_v26 }
  0x55   :  { %1315 = vmatprep.subr.bf16.mxu1 %v1408_v27 }
  0x56   :  { %353 = vmatmul.mubr.bf16.vlgmr.msra.gmra.mxu0 %v1403_v18 }
  0x57   :  { %1312 = vmatmul.mubr.bf16.vlgmr.msra.gmra.mxu1 %v1404_v28  ;;  %362 = vmatprep.mubr.bf16.mxu0 %v1583_v0 }
  0x58   :  { %634 = vmatpush1.bf16.msra.mxu0 %v1405_v29  ;;  %1316 = vmatpush3.bf16.msra.mxu1 %v1408_v27 }
  0x59   :  { %635 = vmatprep.subr.bf16.mxu0 %v1411_v30  ;;  %1317 = vmatprep.subr.bf16.mxu1 %v1412_v32 }
  0x5c   :  { %636 = vmatpush1.bf16.msra.mxu0 %v1409_v31  ;;  %1318 = vmatpush3.bf16.msra.mxu1 %v1412_v32 }
  0x5d   :  { %637 = vmatprep.subr.bf16.mxu0 %v1415_v33  ;;  %1319 = vmatprep.subr.bf16.mxu1 %v1416_v35 }
  0x5e   :  { %363 = vmatmul.mubr.bf16.gmra.mxu0 %v1404_v28 }
  0x5f   :  { %665 = vmatprep.mubr.bf16.mxu0 %v1583_v0 }
  0x60   :  { %638 = vmatpush1.bf16.msra.mxu0 %v1413_v34  ;;  %1320 = vmatpush3.bf16.msra.mxu1 %v1416_v35  ;;  %v1232_v34 = vld [vmem:[%s1810_s2] ss:$0 sm:$0xff] }
  0x61   :  { %639 = vmatprep.subr.bf16.mxu0 %v1419_v36  ;;  %1321 = vmatprep.subr.bf16.mxu1 %v1420_v38 }
  0x64   :  { %640 = vmatpush1.bf16.msra.mxu0 %v1417_v37  ;;  %1322 = vmatpush3.bf16.msra.mxu1 %v1420_v38 }
  0x65   :  { %641 = vmatprep.subr.bf16.mxu0 %v1423_v39  ;;  %1323 = vmatprep.subr.bf16.mxu1 %v1424_v41 }
  0x68   :  { %642 = vmatpush1.bf16.msra.mxu0 %v1421_v40  ;;  %1324 = vmatpush3.bf16.msra.mxu1 %v1424_v41 }
  0x69   :  { %643 = vmatprep.subr.bf16.mxu0 %v1427_v42  ;;  %1325 = vmatprep.subr.bf16.mxu1 %v1428_v44 }
  0x6c   :  { %644 = vmatpush1.bf16.msra.mxu0 %v1425_v43  ;;  %1326 = vmatpush3.bf16.msra.mxu1 %v1428_v44 }
  0x6d   :  { %645 = vmatprep.subr.bf16.mxu0 %v1431_v45  ;;  %1327 = vmatprep.subr.bf16.mxu1 %v1432_v47 }
  0x70   :  { %646 = vmatpush1.bf16.msra.mxu0 %v1429_v46  ;;  %1328 = vmatpush3.bf16.msra.mxu1 %v1432_v47 }
  0x71   :  { %647 = vmatprep.subr.bf16.mxu0 %v1435_v48  ;;  %1329 = vmatprep.subr.bf16.mxu1 %v1436_v50 }
  0x74   :  { %648 = vmatpush1.bf16.msra.mxu0 %v1433_v49  ;;  %1330 = vmatpush3.bf16.msra.mxu1 %v1436_v50 }
 0x116   :  { %v354_v53 = vpop.f32.mrf.mxu0 }
 0x117   :  { %v1313_v54 = vpop.f32.mrf.mxu1  ;;  %v422_v2 = vrot.slane %v354_v53, 7  ;;  %v1437_v53 = vld [vmem:[#allocation8 + $0x38] sm:$0xff]  }
 0x118   :  { %v356_v57 = vpop.f32.mrf.mxu0  ;;  %v437_v62 = vrot.slane %v1313_v54, 1  ;;  %v1584_v54 = vmov 0.0  }
 0x119   :  { %v407_v58 = vpop.f32.mrf.mxu1  ;;  %1335 = vmatprep.subr.bf16.mxu0 %v1584_v54 }
 0x11a   :  { %v358_v59 = vpop.f32.mrf.mxu0  ;;  %v435_v14 = vrot.slane %v407_v58, 1  ;;  %v1441_v58 = vld [vmem:[#allocation8 + $0x18] sm:$0xff]  }
 0x11b   :  { %v1314_v60 = vpop.f32.mrf.mxu1  ;;  %v423_v63 = vrot.slane %v358_v59, 7  ;;  %v1442_v59 = vld [vmem:[#allocation8 + $0x10] sm:$0xff]  }
 0x11c   :  { %v360_v3 = vpop.f32.mrf.mxu0  ;;  %v438_v15 = vrot.slane %v1314_v60, 1  ;;  %v1444_v60 = vld [vmem:[#allocation8] sm:$0xff]  }
 0x11d   :  { %v410_v4 = vpop.f32.mrf.mxu1  ;;  %v429_v7 = vsel %vm426_vm0, %v422_v2, %v423_v63 }
 0x11e   :  { %v436_v6 = vrot.slane %v410_v4, 1  ;;  %v364_v9 = vpop.f32.mrf.mxu0  ;;  %v449_v18 = vadd.f32 %v429_v7, %v360_v3  ;;  %v443_v28 = vsel %vm439_vm1, %v438_v15, %v435_v14  ;;  %v440_v30 = vsel %vm439_vm1, %v437_v62, %v438_v15 }
 0x11f   :  { %v424_v11 = vrot.slane %v364_v9, 7  ;;  %v447_v38 = vsel %vm1686_vm5, %v443_v28, 0.0  ;;  %v1586_v7 = vmov 1983009808  }
 0x120   :  { %v441_v10 = vsel %vm439_vm1, %v436_v6, %v437_v62  ;;  %v366_v16 = vpop.f32.mrf.mxu0  ;;  %v442_v39 = vsel %vm439_vm1, %v435_v14, %v436_v6  ;;  %v792_v9 = vunpack.c.l.s4 %v1586_v7 }
 0x121   :  { %v428_v19 = vsel %vm426_vm0, %v423_v63, %v424_v11  ;;  %v445_v20 = vsel %vm1665_vm2, %v441_v10, 0.0 }
 0x122   :  { %v433_v21 = vsel %vm1671_vm3, %v428_v19, 0.0  ;;  %v368_v22 = vpop.f32.mrf.mxu0  ;;  %v453_v29 = vadd.f32 %v449_v18, %v445_v20  ;;  %v793_v20 = vunpack.c.0.s8 %v792_v9 }
 0x123   :  { %v450_v23 = vadd.f32 %v433_v21, %v366_v16  ;;  %v425_v25 = vrot.slane %v368_v22, 7 }
 0x124   :  { %v370_v27 = vpop.f32.mrf.mxu0  ;;  %v464_v41 = vadd.f32 %v1232_v34, %v453_v29 }
 0x125   :  { %v430_v31 = vsel %vm426_vm0, %v425_v25, %v422_v2  ;;  %v427_v32 = vsel %vm426_vm0, %v424_v11, %v425_v25  ;;  %v454_v33 = vadd.f32 %v450_v23, %v440_v30  ;;  %v1257_v23 = vld [vmem:[%s1812_s4] ss:$0 sm:$0xff]  ;;  %s1587_s4 = smov [#allocation10]  }
 0x126   :  { %v431_v35 = vsel %vm1682_vm4, %v430_v31, 0.0  ;;  %v451_v36 = vadd.f32 %v427_v32, %v370_v27  ;;  %v468_v47 = vmax.f32 %v464_v41, 0.0  ;;  %s1176_s24 = sshll.u32 %s1587_s4, 4  ;;  %s1177_s24 = int_to_ptr.vmem [resolvable:$true] %s1176_s24 }
 0x127   :  { %v448_v37 = vadd.f32 %v431_v35, %v356_v57  ;;  %v465_v43 = vadd.f32 %v1232_v34, %v454_v33  ;;  %v1440_v57 = vld [vmem:[#allocation8 + $0x20] sm:$0xff]   ;;  %s1525_s25 = scalar_lea.vmem %s1177_s24, 512  ;;  %p1530_p7 = scmp.lt.s32.totalorder %s1177_s24, %s1177_s24 }
 0x128   :  { %v455_v40 = vadd.f32 %v451_v36, %v447_v38  ;;  %p1526_p6 = scmp.ne.s32.totalorder %s1177_s24, %s1525_s25  ;;  %p1531_p8 = scmp.lt.s32.totalorder %s1525_s25, %s1525_s25 }
 0x129   :  { %v452_v42 = vadd.f32 %v448_v37, %v442_v39  ;;  %v469_v49 = vmax.f32 %v465_v43, 0.0 }
 0x12a   :  { %v466_v44 = vadd.f32 %v1232_v34, %v455_v40  ;;  %p1532_p9 = por %p1531_p8, %p1530_p7 }
 0x12b   :  { %v463_v45 = vadd.f32 %v1232_v34, %v452_v42  ;;  %v1722_v34 = vsub.s32 %v793_v20, %v1656_v52 }
 0x12c   :  { %v470_v46 = vmax.f32 %v466_v44, 0.0  ;;  %p1533_p10 = pnand %p1532_p9, %p1526_p6 }
 0x12d   :  { %v467_v48 = vmax.f32 %v463_v45, 0.0 }
 0x12e   :  { %v472_v51 = vpack.c.bf16 %v470_v46, %v469_v49 }
 0x12f   :  { %v471_v50 = vpack.c.bf16 %v468_v47, %v467_v48 }
 0x131   :  { %666 = vmatmul.mubr.bf16.vlgmr.msra.gmra.mxu0 %v471_v50  ;;  %1331 = vmatprep.mubr.bf16.mxu1 %v471_v50 }
 0x132   :  { %1332 = vmatmul.mubr.bf16.vlgmr.msra.gmra.mxu1 %v472_v51  ;;  %675 = vmatprep.mubr.bf16.mxu0 %v1583_v0  ;;  %v1443_v0 = vld [vmem:[#allocation8 + $0x8] sm:$0xff]  }
 0x133   :  { %1336 = vmatpush3.bf16.msra.mxu0 %v1437_v53 }
 0x134   :  { %1337 = vmatprep.subr.bf16.mxu0 %v1584_v54 }
 0x137   :  { %1338 = vmatpush3.bf16.msra.mxu0 %v1438_v55 }
 0x138   :  { %1339 = vmatprep.subr.bf16.mxu0 %v1584_v54 }
 0x139   :  { %676 = vmatmul.mubr.bf16.gmra.mxu0 %v472_v51 }
 0x13a   :  { %1351 = vmatprep.mubr.msk.bf16.mxu0 %vm1585_vm6, %v1584_v54 }
 0x13b   :  { %1340 = vmatpush3.bf16.msra.mxu0 %v1439_v56 }
 0x13c   :  { %1341 = vmatprep.subr.bf16.mxu0 %v1584_v54 }
 0x13f   :  { %1342 = vmatpush3.bf16.msra.mxu0 %v1440_v57 }
 0x140   :  { %1343 = vmatprep.subr.bf16.mxu0 %v1584_v54 }
 0x143   :  { %1344 = vmatpush3.bf16.msra.mxu0 %v1441_v58 }
 0x144   :  { %1345 = vmatprep.subr.bf16.mxu0 %v1584_v54 }
 0x147   :  { %1346 = vmatpush3.bf16.msra.mxu0 %v1442_v59 }
 0x148   :  { %1347 = vmatprep.subr.bf16.mxu0 %v1584_v54 }
 0x14b   :  { %1348 = vmatpush3.bf16.msra.mxu0 %v1443_v0 }
 0x14c   :  { %1349 = vmatprep.subr.bf16.mxu0 %v1584_v54 }
 0x14f   :  { %1350 = vmatpush3.bf16.msra.mxu0 %v1444_v60 }
 0x1f1   :  { %v667_v61 = vpop.f32.mrf.mxu0 }
 0x1f2   :  { %v1333_v62 = vpop.f32.mrf.mxu1  ;;  %v735_v3 = vrot.slane %v667_v61, 7 }
 0x1f3   :  { %v669_v63 = vpop.f32.mrf.mxu0  ;;  %v749_v13 = vrot.slane %v1333_v62, 1 }
 0x1f4   :  { %v720_v1 = vpop.f32.mrf.mxu1 }
 0x1f5   :  { %v671_v2 = vpop.f32.mrf.mxu0  ;;  %v747_v27 = vrot.slane %v720_v1, 1 }
 0x1f6   :  { %v736_v4 = vrot.slane %v671_v2, 7  ;;  %v1334_v5 = vpop.f32.mrf.mxu1 }
 0x1f7   :  { %v673_v6 = vpop.f32.mrf.mxu0  ;;  %v750_v17 = vrot.slane %v1334_v5, 1 }
 0x1f8   :  { %v741_v10 = vsel %vm426_vm0, %v735_v3, %v736_v4  ;;  %v723_v11 = vpop.f32.mrf.mxu1 }
 0x1f9   :  { %v748_v14 = vrot.slane %v723_v11, 1  ;;  %v677_v15 = vpop.f32.mrf.mxu0  ;;  %v760_v18 = vadd.f32 %v741_v10, %v673_v6  ;;  %v751_v8 = vsel %vm439_vm1, %v749_v13, %v750_v17  ;;  %v754_v36 = vsel %vm439_vm1, %v750_v17, %v747_v27 }
 0x1fa   :  { %v737_v16 = vrot.slane %v677_v15, 7  ;;  %v758_v44 = vsel %vm1686_vm5, %v754_v36, 0.0 }
 0x1fb   :  { %v752_v19 = vsel %vm439_vm1, %v748_v14, %v749_v13  ;;  %v679_v21 = vpop.f32.mrf.mxu0  ;;  %v753_v45 = vsel %vm439_vm1, %v747_v27, %v748_v14 }
 0x1fc   :  { %v756_v22 = vsel %vm1665_vm2, %v752_v19, 0.0  ;;  %v740_v25 = vsel %vm426_vm0, %v736_v4, %v737_v16 }
 0x1fd   :  { %v764_v28 = vadd.f32 %v760_v18, %v756_v22  ;;  %v745_v29 = vsel %vm1671_vm3, %v740_v25, 0.0  ;;  %v681_v30 = vpop.f32.mrf.mxu0 }
 0x1fe   :  { %v761_v31 = vadd.f32 %v745_v29, %v679_v21  ;;  %v738_v32 = vrot.slane %v681_v30, 7 }
 0x1ff   :  { %v775_v33 = vadd.f32 %v1257_v23, %v764_v28  ;;  %v683_v35 = vpop.f32.mrf.mxu0 }
 0x200   :  { %v765_v37 = vadd.f32 %v761_v31, %v751_v8  ;;  %v742_v38 = vsel %vm426_vm0, %v738_v32, %v735_v3  ;;  %v739_v12 = vsel %vm426_vm0, %v737_v16, %v738_v32 }
 0x201   :  { %v779_v39 = vmax.f32 %v775_v33, 0.0  ;;  %v743_v40 = vsel %vm1682_vm4, %v742_v38, 0.0  ;;  %v762_v41 = vadd.f32 %v739_v12, %v683_v35 }
 0x202   :  { %v776_v42 = vadd.f32 %v1257_v23, %v765_v37  ;;  %v759_v43 = vadd.f32 %v743_v40, %v669_v63 }
 0x203   :  { %783 = vst [vmem:[#allocation10 + $0x8] sm:$0xff] %v779_v39  ;;  %v807_v46 = vcombine.high %v779_v39, %v779_v39  ;;  %v814_v47 = vrot.slane %v779_v39, %v1722_v34  ;;  %v766_v48 = vadd.f32 %v762_v41, %v758_v44 }
 0x204   :  { %v780_v49 = vmax.f32 %v776_v42, 0.0  ;;  %v763_v50 = vadd.f32 %v759_v43, %v753_v45 }
 0x205   :  { %v821_v24 = vrot.slane %v807_v46, %v1722_v34  ;;  %v822_v51 = vcombine.high %v814_v47, %v814_v47  ;;  %v903_v53 = vsel %vm874_vm7, %v814_v47, -inf  ;;  %v777_v54 = vadd.f32 %v1257_v23, %v766_v48 }
 0x206   :  { %v904_v55 = vrot.slane %v903_v53, 4  ;;  %784 = vst [vmem:[#allocation10 + $0x10] sm:$0xff] %v780_v49  ;;  %v824_v26 = vcombine.high %v780_v49, %v780_v49  ;;  %v831_v56 = vrot.slane %v780_v49, %v1722_v34  ;;  %v774_v52 = vadd.f32 %v1257_v23, %v763_v50 }
 0x207   :  { %v823_v57 = vcombine.high %v821_v24, %v821_v24  ;;  %v910_v58 = vsel %vm874_vm7, %v822_v51, -inf  ;;  %v917_v59 = vsel %vm874_vm7, %v821_v24, -inf  ;;  %v1744_v0 = vmax.f32 %v777_v54, 0.0 }
 0x208   :  { %v905_v60 = vmax.f32 %v903_v53, %v904_v55  ;;  %v911_v61 = vrot.slane %v910_v58, 4  ;;  %v918_v62 = vrot.slane %v917_v59, 4  ;;  %v838_v63 = vrot.slane %v824_v26, %v1722_v34 }
 0x209   :  { %v924_v1 = vsel %vm874_vm7, %v823_v57, -inf  ;;  %v839_v2 = vcombine.high %v831_v56, %v831_v56  ;;  %v931_v3 = vsel %vm874_vm7, %v831_v56, -inf  ;;  %v778_v4 = vmax.f32 %v774_v52, 0.0  ;;  %785 = vst [vmem:[#allocation10 + $0x18] sm:$0xff] %v1744_v0 }
 0x20a   :  { %v906_v5 = vrot.slane %v905_v60, 2  ;;  %v912_v6 = vmax.f32 %v910_v58, %v911_v61  ;;  %v919_v7 = vmax.f32 %v917_v59, %v918_v62  ;;  %v925_v9 = vrot.slane %v924_v1, 4 }
 0x20b   :  { %v840_v10 = vcombine.high %v838_v63, %v838_v63  ;;  %v932_v11 = vrot.slane %v931_v3, 4  ;;  %v938_v13 = vsel %vm874_vm7, %v839_v2, -inf  ;;  %v945_v14 = vsel %vm874_vm7, %v838_v63, -inf  ;;  %782 = vst [vmem:[#allocation10] sm:$0xff] %v778_v4 }
 0x20c   :  { %v907_v15 = vmax.f32 %v905_v60, %v906_v5  ;;  %v913_v16 = vrot.slane %v912_v6, 2  ;;  %v920_v17 = vrot.slane %v919_v7, 2  ;;  %v1752_v18 = vmax.f32 %v924_v1, %v925_v9 }
 0x20d   :  { %v933_v19 = vmax.f32 %v931_v3, %v932_v11  ;;  %v939_v20 = vrot.slane %v938_v13, 4  ;;  %v946_v21 = vrot.slane %v945_v14, 4  ;;  %v952_v22 = vsel %vm874_vm7, %v840_v10, -inf }
 0x20e   :  { %v908_v23 = vrot.slane %v907_v15, 1  ;;  %v914_v25 = vmax.f32 %v912_v6, %v913_v16  ;;  %v1755_v27 = vmax.f32 %v919_v7, %v920_v17  ;;  %v953_v31 = vrot.slane %v952_v22, 4 }
 0x20f   :  { %v934_v28 = vrot.slane %v933_v19, 2  ;;  %v940_v29 = vmax.f32 %v938_v13, %v939_v20  ;;  %v947_v30 = vmax.f32 %v945_v14, %v946_v21  ;;  %v927_v8 = vrot.slane %v1752_v18, 2 }
 0x210   :  { %v909_v32 = vmax.f32 %v907_v15, %v908_v23  ;;  %v915_v33 = vrot.slane %v914_v25, 1  ;;  %v790_v35 = vcombine.high %v778_v4, %v778_v4  ;;  %v954_v12 = vmax.f32 %v952_v22, %v953_v31 }
 0x211   :  { %v935_v36 = vmax.f32 %v933_v19, %v934_v28  ;;  %v941_v37 = vrot.slane %v940_v29, 2  ;;  %v948_v38 = vrot.slane %v947_v30, 2  ;;  %v922_v40 = vrot.slane %v1755_v27, 1 }
 0x212   :  { %v1758_v39 = vmax.f32 %v914_v25, %v915_v33  ;;  %v797_v41 = vrot.slane %v778_v4, %v1722_v34  ;;  %v804_v42 = vrot.slane %v790_v35, %v1722_v34  ;;  %v955_v46 = vrot.slane %v954_v12, 2 }
 0x213   :  { %v936_v43 = vrot.slane %v935_v36, 1  ;;  %v942_v44 = vmax.f32 %v940_v29, %v941_v37  ;;  %v949_v45 = vmax.f32 %v947_v30, %v948_v38  ;;  %v991_v47 = vpack.c.bf16 %v909_v32, %v909_v32 }
 0x214   :  { %v805_v48 = vcombine.high %v797_v41, %v797_v41  ;;  %v806_v49 = vcombine.high %v804_v42, %v804_v42  ;;  %v875_v50 = vsel %vm874_vm7, %v797_v41, -inf  ;;  %v956_v54 = vmax.f32 %v954_v12, %v955_v46 }
 0x215   :  { %v937_v24 = vmax.f32 %v935_v36, %v936_v43  ;;  %v943_v51 = vrot.slane %v942_v44, 1  ;;  %v950_v53 = vrot.slane %v949_v45, 1  ;;  %v876_v55 = vrot.slane %v875_v50, 4 }
 0x216   :  { %v882_v26 = vsel %vm874_vm7, %v805_v48, -inf  ;;  %v889_v56 = vsel %vm874_vm7, %v804_v42, -inf  ;;  %v896_v52 = vsel %vm874_vm7, %v806_v49, -inf  ;;  %v957_v59 = vrot.slane %v956_v54, 1 }
 0x217   :  { %v944_v57 = vmax.f32 %v942_v44, %v943_v51  ;;  %v951_v58 = vmax.f32 %v949_v45, %v950_v53  ;;  %v995_v60 = vpack.c.bf16 %v937_v24, %v937_v24  ;;  %v877_v61 = vmax.f32 %v875_v50, %v876_v55 }
 0x218   :  { %v883_v62 = vrot.slane %v882_v26, 4  ;;  %v890_v63 = vrot.slane %v889_v56, 4  ;;  %v897_v1 = vrot.slane %v896_v52, 4  ;;  %v1767_v2 = vunpack.c.l.b16 %v991_v47 }
 0x219   :  { %v958_v3 = vmax.f32 %v956_v54, %v957_v59  ;;  %v996_v4 = vpack.c.bf16 %v944_v57, %v944_v57  ;;  %v997_v5 = vpack.c.bf16 %v951_v58, %v951_v58  ;;  %v878_v6 = vrot.slane %v877_v61, 2 }
 0x21a   :  { %v884_v7 = vmax.f32 %v882_v26, %v883_v62  ;;  %v891_v9 = vmax.f32 %v889_v56, %v890_v63  ;;  %v898_v10 = vmax.f32 %v896_v52, %v897_v1  ;;  %v1043_v13 = vunpack.c.l.b16 %v995_v60 }
 0x21b   :  { %v998_v11 = vpack.c.bf16 %v958_v3, %v958_v3  ;;  %v1044_v14 = vunpack.c.l.b16 %v996_v4  ;;  %v841_v15 = vcombine.high %v1744_v0, %v1744_v0  ;;  %v879_v16 = vmax.f32 %v877_v61, %v878_v6 }
 0x21c   :  { %v885_v17 = vrot.slane %v884_v7, 2  ;;  %v892_v19 = vrot.slane %v891_v9, 2  ;;  %v899_v20 = vrot.slane %v898_v10, 2  ;;  %v1045_v21 = vunpack.c.l.b16 %v997_v5 }
 0x21d   :  { %v1771_v22 = vunpack.c.l.b16 %v998_v11  ;;  %v848_v23 = vrot.slane %v1744_v0, %v1722_v34  ;;  %v855_v25 = vrot.slane %v841_v15, %v1722_v34  ;;  %v1065_v28 = vsel %vm1051_vm8, %v1044_v14, %v1043_v13 }
 0x21e   :  { %v880_v29 = vrot.slane %v879_v16, 1  ;;  %v886_v30 = vmax.f32 %v884_v7, %v885_v17  ;;  %v893_v31 = vmax.f32 %v891_v9, %v892_v19  ;;  %v900_v32 = vmax.f32 %v898_v10, %v899_v20 }
 0x21f   :  { %v856_v33 = vcombine.high %v848_v23, %v848_v23  ;;  %v857_v35 = vcombine.high %v855_v25, %v855_v25  ;;  %v959_v36 = vsel %vm874_vm7, %v848_v23, -inf  ;;  %v973_v0 = vsel %vm874_vm7, %v855_v25, -inf }
 0x220   :  { %v881_v37 = vmax.f32 %v879_v16, %v880_v29  ;;  %v887_v38 = vrot.slane %v886_v30, 1  ;;  %v894_v12 = vrot.slane %v893_v31, 1  ;;  %v960_v41 = vrot.slane %v959_v36, 4 }
 0x221   :  { %v901_v42 = vrot.slane %v900_v32, 1  ;;  %v966_v43 = vsel %vm874_vm7, %v856_v33, -inf  ;;  %v980_v34 = vsel %vm874_vm7, %v857_v35, -inf  ;;  %v974_v50 = vrot.slane %v973_v0, 4 }
 0x222   :  { %v888_v44 = vmax.f32 %v886_v30, %v887_v38  ;;  %v895_v45 = vmax.f32 %v893_v31, %v894_v12  ;;  %v987_v46 = vpack.c.bf16 %v881_v37, %v881_v37  ;;  %v961_v47 = vmax.f32 %v959_v36, %v960_v41 }
 0x223   :  { %v902_v48 = vmax.f32 %v900_v32, %v901_v42  ;;  %v967_v49 = vrot.slane %v966_v43, 4  ;;  %v981_v24 = vrot.slane %v980_v34, 4  ;;  %v1066_v51 = vsel %vm1053_vm9, %v1045_v21, %v1065_v28 }
 0x224   :  { %v988_v53 = vpack.c.bf16 %v888_v44, %v888_v44  ;;  %v989_v54 = vpack.c.bf16 %v895_v45, %v895_v45  ;;  %v962_v55 = vrot.slane %v961_v47, 2  ;;  %v1035_v26 = vunpack.c.l.b16 %v987_v46 }
 0x225   :  { %v968_v56 = vmax.f32 %v966_v43, %v967_v49  ;;  %v975_v52 = vmax.f32 %v973_v0, %v974_v50  ;;  %v982_v57 = vmax.f32 %v980_v34, %v981_v24  ;;  %v923_v60 = vmax.f32 %v1755_v27, %v922_v40 }
 0x226   :  { %v1036_v58 = vunpack.c.l.b16 %v988_v53  ;;  %v963_v59 = vmax.f32 %v961_v47, %v962_v55  ;;  %v928_v61 = vmax.f32 %v1752_v18, %v927_v8  ;;  %v990_v3 = vpack.c.bf16 %v902_v48, %v902_v48 }
 0x227   :  { %v969_v62 = vrot.slane %v968_v56, 2  ;;  %v976_v63 = vrot.slane %v975_v52, 2  ;;  %v983_v1 = vrot.slane %v982_v57, 2  ;;  %v1037_v4 = vunpack.c.l.b16 %v989_v54 }
 0x228   :  { %v964_v5 = vrot.slane %v963_v59, 1  ;;  %v929_v6 = vrot.slane %v928_v61, 1  ;;  %v992_v7 = vpack.c.bf16 %v1758_v39, %v1758_v39  ;;  %v1038_v13 = vunpack.c.l.b16 %v990_v3 }
 0x229   :  { %v970_v9 = vmax.f32 %v968_v56, %v969_v62  ;;  %v977_v10 = vmax.f32 %v975_v52, %v976_v63  ;;  %v984_v11 = vmax.f32 %v982_v57, %v983_v1  ;;  %v993_v14 = vpack.c.bf16 %v923_v60, %v923_v60 }
 0x22a   :  { %v965_v27 = vmax.f32 %v963_v59, %v964_v5  ;;  %v930_v40 = vmax.f32 %v928_v61, %v929_v6  ;;  %v1040_v15 = vunpack.c.l.b16 %v992_v7  ;;  %v1052_v17 = vsel %vm1051_vm8, %v1036_v58, %v1035_v26 }
 0x22b   :  { %v971_v18 = vrot.slane %v970_v9, 1  ;;  %v978_v8 = vrot.slane %v977_v10, 1  ;;  %v985_v16 = vrot.slane %v984_v11, 1  ;;  %v1054_v21 = vsel %vm1053_vm9, %v1037_v4, %v1052_v17 }
 0x22c   :  { %v999_v19 = vpack.c.bf16 %v965_v27, %v965_v27  ;;  %v994_v20 = vpack.c.bf16 %v930_v40, %v930_v40  ;;  %v1067_v39 = vsel %vm1055_vm10, %v1771_v22, %v1066_v51  ;;  %v1056_v29 = vsel %vm1055_vm10, %v1038_v13, %v1054_v21 }
 0x22d   :  { %v972_v23 = vmax.f32 %v970_v9, %v971_v18  ;;  %v979_v25 = vmax.f32 %v977_v10, %v978_v8  ;;  %v986_v28 = vmax.f32 %v984_v11, %v985_v16  ;;  %v1041_v31 = vunpack.c.l.b16 %v993_v14 }
 0x22e   :  { %v1047_v30 = vunpack.c.l.b16 %v999_v19  ;;  %v1058_v32 = vsel %vm1057_vm11, %v1767_v2, %v1056_v29  ;;  %v1042_v41 = vunpack.c.l.b16 %v994_v20 }
 0x22f   :  { %v1000_v33 = vpack.c.bf16 %v972_v23, %v972_v23  ;;  %v1001_v35 = vpack.c.bf16 %v979_v25, %v979_v25  ;;  %v1002_v36 = vpack.c.bf16 %v986_v28, %v986_v28  ;;  %v1060_v37 = vsel %vm1059_vm12, %v1040_v15, %v1058_v32 }
 0x230   :  { %v1062_v38 = vsel %vm1061_vm13, %v1041_v31, %v1060_v37  ;;  %v1068_v12 = vsel %vm1057_vm11, %v1047_v30, %v1067_v39 }
 0x231   :  { %v1048_v22 = vunpack.c.l.b16 %v1000_v33  ;;  %v1050_v42 = vunpack.c.l.b16 %v1002_v36  ;;  %v1049_v43 = vunpack.c.l.b16 %v1001_v35  ;;  %v1064_v0 = vsel %vm1063_vm14, %v1042_v41, %v1062_v38 }
 0x233   :  { %v1069_v34 = vsel %vm1059_vm12, %v1048_v22, %v1068_v12 }
 0x234   :  { %v1070_v44 = vsel %vm1061_vm13, %v1049_v43, %v1069_v34 }
 0x235   :  { %v1071_v45 = vsel %vm1063_vm14, %v1050_v42, %v1070_v44 }
 0x236   :  { %v1072_v2 = vpack.c.b16 %v1071_v45, %v1064_v0 }
 0x238   :  { %1352 = vmatmul.mubr.bf16.vlgmr.msra.gmra.mxu0 %v1072_v2 }
 0x239   :  { %1536 = shalt.err (!%p1533_p10)
}
 0x23a   :  { %s1588_s26 = smov 128   ;;  %s1589_s27 = smov 8  }
 0x23b   :  { %1182 = dma.vmem_to_hbm [thread:$0]  %s1177_s24, 512, %s1814_s6, [#allocation4], %s1588_s26, %s1588_s26, %s1589_s27  }
 0x23c   :  { %s1590_s30 = smov [#allocation11]  }
 0x23d   :  { %s1188_s8 = sshll.u32 %s1590_s30, 4  ;;  %s1189_s8 = int_to_ptr.vmem [resolvable:$true] %s1188_s8 }
 0x23e   :  { %s1545_s9 = scalar_lea.vmem %s1189_s8, 256  ;;  %p1550_p12 = scmp.lt.s32.totalorder %s1189_s8, %s1189_s8 }
 0x23f   :  { %p1546_p11 = scmp.ne.s32.totalorder %s1189_s8, %s1545_s9  ;;  %p1551_p13 = scmp.lt.s32.totalorder %s1545_s9, %s1545_s9 }
 0x241   :  { %p1552_p0 = por %p1551_p13, %p1550_p12 }
 0x243   :  { %p1553_p1 = pnand %p1552_p0, %p1546_p11 }
 0x2f8   :  { %v1156_v46 = vpop.f32.mrf.mxu0 }
 0x2f9   :  { %1163 = vrot.lane.b32.xlu0 %v1156_v46, %s1579_s11 }
 0x2fa   :  { %v1353_v47 = vpop.f32.mrf.mxu0 }
 0x2fc   :  { %v1159_v48 = vpop.f32.mrf.mxu0 }
 0x2fd   :  { %1165 = vrot.lane.b32.xlu0 %v1159_v48, %s1579_s11 }
 0x2fe   :  { %v1354_v49 = vpop.f32.mrf.mxu0 }
 0x36b   :  { %v1164_v50 = vpop.permute.xlu0 %1163 }
 0x36c   :  { %v1167_v24 = vmax.f32 %v1156_v46, %v1164_v50 }
 0x36e   :  { %1169 = vst [vmem:[#allocation11] sm:$0xff] %v1167_v24 }
 0x36f   :  { %v1166_v51 = vpop.permute.xlu0 %1165 }
 0x370   :  { %v1168_v53 = vmax.f32 %v1159_v48, %v1166_v51 }
 0x372   :  { %1170 = vst [vmem:[#allocation11 + $0x8] sm:$0xff] %v1168_v53 }
 0x373   :  { %1556 = shalt.err (!%p1553_p1)
}
 0x374   :  { %1194 = dma.vmem_to_hbm [thread:$0]  %s1189_s8, 256, %s1815_s7, [#allocation12], %s1588_s26, %s1588_s26, %s1589_s27  }
 0x375   :  { %1571 = dma.done.wait [#allocation4], 512  }
 0x376   :  { %1572 = vsyncadd [#allocation4], 4294966784 }
 0x377   :  { %1573 = dma.done.wait [#allocation12], 256  }
 0x378   :  { %1574 = vsyncadd [#allocation12], 4294967040 }
 0x379   :  { %1201 = vsyncpa [#allocation3], 1 }
 0x37a   :  { %1202 = vsyncpa [#allocation6], 1 }
 0x37b   :  { %1203 = vsyncpa [#allocation9], 1 }
 0x37c   :  { %1204 = vsyncpa [#allocation4], 1 }
 0x37d   :  { %1205 = vsyncpa [#allocation12], 1 }

</bundles_post_ra>
